<compile_context>
chip_gen: v5e
topology: v5e:2x2
jax: 0.10.0
libtpu: 0.0.40
codegen_flags: <defaults>
</compile_context>

<pallas_src>
import jax
import jax.numpy as jnp
from jax.experimental import pallas as pl
from jax.experimental.pallas import tpu as pltpu

_COLS = 1024          # lane dim: multiple of 128 -> unmasked full-width stores
_BLOCK_ROWS = 512     # (512, 1024) f32 = 2 MiB per block per array


def _fdiv_kernel(x_ref, y_ref, o_ref):
    # Faithful to the PyTorch forward: x = x/2 ; y = y/2 ; out = x/y
    o_ref[...] = (x_ref[...] / 2) / (y_ref[...] / 2)


def fdiv(x, y):
    assert x.shape == y.shape and x.dtype == y.dtype
    orig_shape = x.shape
    n = x.size

    xf = x.reshape(-1)
    yf = y.reshape(-1)

    # Lane-dense 2-D layout: rows x _COLS, rows padded to a block multiple.
    rows = pl.cdiv(n, _COLS)
    block_rows = min(_BLOCK_ROWS, ((rows + 7) // 8) * 8)   # sublane-aligned
    rows_padded = ((rows + block_rows - 1) // block_rows) * block_rows
    n_padded = rows_padded * _COLS

    pad = n_padded - n
    if pad:
        xf = jnp.pad(xf, (0, pad))
        # pad y with 1 so the (discarded) padded region never divides by 0
        yf = jnp.pad(yf, (0, pad), constant_values=1)

    x2 = xf.reshape(rows_padded, _COLS)
    y2 = yf.reshape(rows_padded, _COLS)

    grid = (rows_padded // block_rows,)

    out2 = pl.pallas_call(
        _fdiv_kernel,
        out_shape=jax.ShapeDtypeStruct((rows_padded, _COLS), x.dtype),
        grid=grid,
        in_specs=[
            pl.BlockSpec((block_rows, _COLS), lambda i: (i, 0)),
            pl.BlockSpec((block_rows, _COLS), lambda i: (i, 0)),
        ],
        out_specs=pl.BlockSpec((block_rows, _COLS), lambda i: (i, 0)),
        compiler_params=pltpu.CompilerParams(
            dimension_semantics=("parallel",),
        ),
    )(x2, y2)

    return out2.reshape(-1)[:n].reshape(orig_shape)


if __name__ == "__main__":
    key = jax.random.PRNGKey(0)
    kx, ky = jax.random.split(key)
    shape = (2, 4, 16, 16)  # NCHW
    x = jax.random.normal(kx, shape, dtype=jnp.float32)
    # keep y away from zero to avoid div-by-zero in the example
    y = jax.random.normal(ky, shape, dtype=jnp.float32) + 3.0

    out = fdiv(x, y)
    out = jax.block_until_ready(out)

    ref = (x / 2) / (y / 2)
    assert jnp.allclose(out, ref, rtol=1e-6, atol=1e-6), "mismatch vs reference"
    print("KERNEL_OK")
</pallas_src>

<mosaic_0001>
module attributes {stable_mosaic.version = 11 : i64} {
  func.func @_fdiv_kernel(%arg0: i32, %arg1: memref<8x1024xf32, #tpu.memory_space<vmem>>, %arg2: memref<8x1024xf32, #tpu.memory_space<vmem>>, %arg3: memref<8x1024xf32, #tpu.memory_space<vmem>>) attributes {dimension_semantics = [#tpu.dimension_semantics<parallel>], iteration_bounds = array<i64: 1>, scalar_prefetch = 0 : i64, scratch_operands = 0 : i64, tpu.core_type = #tpu.core_type<tc>, window_params = [{transform_indices = @transform_0, window_bounds = array<i64: 8, 1024>}, {transform_indices = @transform_1, window_bounds = array<i64: 8, 1024>}, {transform_indices = @transform_2, window_bounds = array<i64: 8, 1024>}]} {
    %c0 = arith.constant 0 : index
    %c0_0 = arith.constant 0 : index
    %0 = vector.load %arg1[%c0, %c0_0] : memref<8x1024xf32, #tpu.memory_space<vmem>>, vector<8x1024xf32>
    %cst = arith.constant 2.000000e+00 : f32
    %1 = vector.broadcast %cst : f32 to vector<8x1024xf32>
    %2 = arith.divf %0, %1 : vector<8x1024xf32>
    %c0_1 = arith.constant 0 : index
    %c0_2 = arith.constant 0 : index
    %3 = vector.load %arg2[%c0_1, %c0_2] : memref<8x1024xf32, #tpu.memory_space<vmem>>, vector<8x1024xf32>
    %cst_3 = arith.constant 2.000000e+00 : f32
    %4 = vector.broadcast %cst_3 : f32 to vector<8x1024xf32>
    %5 = arith.divf %3, %4 : vector<8x1024xf32>
    %6 = arith.divf %2, %5 : vector<8x1024xf32>
    %c0_4 = arith.constant 0 : index
    %c0_5 = arith.constant 0 : index
    %7 = vector.load %arg3[%c0_4, %c0_5] : memref<8x1024xf32, #tpu.memory_space<vmem>>, vector<8x1024xf32>
    tpu.vector_store %arg3[%c0_4, %c0_5], %6 {strides = array<i32>} : memref<8x1024xf32, #tpu.memory_space<vmem>>, vector<8x1024xf32>,
    return
  }
  func.func @transform_0(%arg0: i32) -> (i32, i32) {
    %c0_i32 = arith.constant 0 : i32
    %c0_i32_0 = arith.constant 0 : i32
    return %arg0, %c0_i32 : i32, i32
  }
  func.func @transform_1(%arg0: i32) -> (i32, i32) {
    %c0_i32 = arith.constant 0 : i32
    %c0_i32_0 = arith.constant 0 : i32
    return %arg0, %c0_i32 : i32, i32
  }
  func.func @transform_2(%arg0: i32) -> (i32, i32) {
    %c0_i32 = arith.constant 0 : i32
    %c0_i32_0 = arith.constant 0 : i32
    return %arg0, %c0_i32 : i32, i32
  }
}

</mosaic_0001>

<bundles_post_ra>
// kernel: tpu_custom_call.1
= control target key start
LH: loop header
LB: loop body
LE: loop exit
PB: predicated region body
PF: predicated region fallthrough
CT: control target
= control target key end

     0   :  { %7 = vsyncpa [#allocation3], 0  ;;  %s497_s0 = inlined_call_operand.hbm [shape: f32[8,1024], index: 0, kind: input, shape index: {}]   ;;  %s498_s1 = inlined_call_operand.hbm [shape: f32[8,1024], index: 1, kind: input, shape index: {}]   ;;  %s499_s2 = inlined_call_operand.hbm [shape: f32[8,1024], index: 2, kind: output, shape index: {}]  }
   0x1   :  { %8 = vsyncpa [#allocation6], 0 }
   0x2   :  { %9 = vsyncpa [#allocation4], 0  ;;  %s15_s11 = sshll.u32 %s497_s0, 4  ;;  %s325_s12 = smov [#allocation2]   ;;  %s16_s11 = int_to_ptr.hbm [resolvable:$true] %s15_s11 }
   0x3   :  { %s17_s13 = sshll.u32 %s325_s12, 4  ;;  %s26_s16 = sshll.u32 %s498_s1, 4  ;;  %s18_s13 = int_to_ptr.vmem [resolvable:$true] %s17_s13  ;;  %s27_s16 = int_to_ptr.hbm [resolvable:$true] %s26_s16 }
   0x4   :  { %20 = dma.hbm_to_vmem [thread:$0]  %s16_s11, 1024, %s18_s13, [#allocation3]  }
   0x5   :  { %s326_s17 = smov [#allocation5]  }
   0x6   :  { %s28_s18 = sshll.u32 %s326_s17, 4  ;;  %s29_s18 = int_to_ptr.vmem [resolvable:$true] %s28_s18 }
   0x7   :  { %31 = dma.hbm_to_vmem [thread:$0]  %s27_s16, 1024, %s29_s18, [#allocation6]  }
   0x8   :  { %319 = dma.done.wait [#allocation3], 1024  }
   0x9   :  { %320 = vsyncadd [#allocation3], 4294966272 }
   0xa   :  { %321 = dma.done.wait [#allocation6], 1024  }
   0xb   :  { %322 = vsyncadd [#allocation6], 4294966272  ;;  %v327_v0 = vmov 2.0   ;;  %v63_v6 = vld [vmem:[#allocation5] sm:$0xff]  ;;  %v64_v7 = vld [vmem:[#allocation5 + $0x8] sm:$0xff]  ;;  %s328_s0 = smov [#allocation7]  }
   0xc   :  { %229 = vrcp.f32 %v327_v0  ;;  %v65_v8 = vld [vmem:[#allocation5 + $0x10] sm:$0xff]  ;;  %v66_v10 = vld [vmem:[#allocation5 + $0x18] sm:$0xff]  ;;  %v40_v11 = vld [vmem:[#allocation2] sm:$0xff]  ;;  %s212_s1 = sshll.u32 %s328_s0, 4  ;;  %s214_s21 = sshll.u32 %s499_s2, 4  ;;  %s213_s1 = int_to_ptr.vmem [resolvable:$true] %s212_s1  ;;  %s215_s21 = int_to_ptr.hbm [resolvable:$true] %s214_s21 }
   0xd   :  { %v41_v14 = vld [vmem:[#allocation2 + $0x8] sm:$0xff]  ;;  %v42_v16 = vld [vmem:[#allocation2 + $0x10] sm:$0xff]  ;;  %v43_v17 = vld [vmem:[#allocation2 + $0x18] sm:$0xff] }
   0xe   :  { %v67_v25 = vld [vmem:[#allocation5 + $0x20] sm:$0xff]  ;;  %v68_v30 = vld [vmem:[#allocation5 + $0x28] sm:$0xff]  ;;  %v69_v59 = vld [vmem:[#allocation5 + $0x30] sm:$0xff] }
   0xf   :  { %v44_v35 = vld [vmem:[#allocation2 + $0x20] sm:$0xff] }
  0x12   :  { %v230_v1 = vpop.eup %229 }
  0x13   :  { %v49_v2 = vmul.f32 2.0, %v230_v1  ;;  %vm53_vm0 = vweird.f32 %v230_v1 }
  0x15   :  { %v50_v3 = vsub.f32 1.0, %v49_v2 }
  0x17   :  { %v51_v4 = vmul.f32 %v230_v1, %v50_v3 }
  0x19   :  { %v52_v5 = vadd.f32 %v230_v1, %v51_v4 }
  0x1b   :  { %v350_v9 = vsel %vm53_vm0, %v230_v1, %v52_v5 }
  0x1c   :  { %v71_v12 = vmul.f32 %v63_v6, %v350_v9  ;;  %v354_v13 = vmul.f32 %v64_v7, %v350_v9  ;;  %v357_v15 = vmul.f32 %v65_v8, %v350_v9  ;;  %v360_v18 = vmul.f32 %v66_v10, %v350_v9 }
  0x1d   :  { %v363_v19 = vmul.f32 %v350_v9, %v40_v11  ;;  %v367_v22 = vmul.f32 %v350_v9, %v41_v14  ;;  %v373_v26 = vmul.f32 %v350_v9, %v42_v16  ;;  %v378_v29 = vmul.f32 %v350_v9, %v43_v17 }
  0x1e   :  { %231 = vrcp.f32 %v71_v12  ;;  %v88_v20 = vand.u32 2147483647, %v71_v12  ;;  %v90_v21 = vand.u32 2147483648, %v71_v12  ;;  %v103_v23 = vand.u32 2147483647, %v354_v13 }
  0x1f   :  { %233 = vrcp.f32 %v354_v13  ;;  %v105_v24 = vand.u32 2147483648, %v354_v13  ;;  %v118_v27 = vand.u32 2147483647, %v357_v15  ;;  %v120_v28 = vand.u32 2147483648, %v357_v15 }
  0x20   :  { %235 = vrcp.f32 %v357_v15  ;;  %vm84_vm1 = vweird.f32 %v71_v12  ;;  %vm99_vm2 = vweird.f32 %v354_v13  ;;  %v135_v31 = vand.u32 2147483648, %v360_v18 }
  0x21   :  { %237 = vrcp.f32 %v360_v18  ;;  %vm383_vm3 = vcmp.eq.f32.partialorder %v88_v20, 8.507059e+37  ;;  %v91_v33 = vor.u32 1.1754944e-38, %v90_v21  ;;  %vm114_vm4 = vweird.f32 %v357_v15 }
  0x22   :  { %v133_v34 = vand.u32 2147483647, %v360_v18  ;;  %v390_v36 = vmul.f32 %v67_v25, %v350_v9  ;;  %vm392_vm5 = vcmp.eq.f32.partialorder %v103_v23, 8.507059e+37  ;;  %v106_v39 = vor.u32 1.1754944e-38, %v105_v24 }
  0x23   :  { %vm129_vm6 = vweird.f32 %v360_v18  ;;  %v398_v40 = vmul.f32 %v68_v30, %v350_v9  ;;  %vm400_vm7 = vcmp.eq.f32.partialorder %v118_v27, 8.507059e+37  ;;  %v121_v44 = vor.u32 1.1754944e-38, %v120_v28 }
  0x24   :  { %v232_v37 = vpop.eup %231  ;;  %239 = vrcp.f32 %v390_v36  ;;  %v136_v47 = vor.u32 1.1754944e-38, %v135_v31  ;;  %v407_v48 = vmul.f32 %v350_v9, %v44_v35  ;;  %v150_v49 = vand.u32 2147483648, %v390_v36  ;;  %v45_v31 = vld [vmem:[#allocation2 + $0x28] sm:$0xff] }
  0x25   :  { %v234_v41 = vpop.eup %233  ;;  %v80_v42 = vmul.f32 %v232_v37, %v71_v12  ;;  %vm85_vm8 = vweird.f32 %v232_v37  ;;  %vm411_vm9 = vcmp.eq.f32.partialorder %v133_v34, 8.507059e+37  ;;  %241 = vrcp.f32 %v398_v40 }
  0x26   :  { %v236_v45 = vpop.eup %235  ;;  %v95_v46 = vmul.f32 %v234_v41, %v354_v13  ;;  %vm100_vm10 = vweird.f32 %v234_v41  ;;  %vm144_vm11 = vweird.f32 %v390_v36  ;;  %v148_v55 = vand.u32 2147483647, %v390_v36  ;;  %vm420_vm13 = vmor %vm84_vm1, %vm85_vm8 }
  0x27   :  { %v81_v50 = vsub.f32 1.0, %v80_v42  ;;  %v110_v51 = vmul.f32 %v236_v45, %v357_v15  ;;  %v238_v53 = vpop.eup %237  ;;  %vm115_vm12 = vweird.f32 %v236_v45  ;;  %v151_v62 = vor.u32 1.1754944e-38, %v150_v49  ;;  %vm428_vm0 = vmor %vm99_vm2, %vm100_vm10 }
  0x28   :  { %v96_v54 = vsub.f32 1.0, %v95_v46  ;;  %v125_v58 = vmul.f32 %v238_v53, %v360_v18  ;;  %vm130_vm14 = vweird.f32 %v238_v53  ;;  %vm159_vm15 = vweird.f32 %v398_v40  ;;  %vm436_vm1 = vmor %vm114_vm4, %vm115_vm12 }
  0x29   :  { %v82_v56 = vmul.f32 %v232_v37, %v81_v50  ;;  %v111_v57 = vsub.f32 1.0, %v110_v51  ;;  %v163_v4 = vand.u32 2147483647, %v398_v40  ;;  %v165_v8 = vand.u32 2147483648, %v398_v40  ;;  %vm454_vm4 = vmor %vm129_vm6, %vm130_vm14 }
  0x2a   :  { %v97_v61 = vmul.f32 %v234_v41, %v96_v54  ;;  %v240_v63 = vpop.eup %239  ;;  %v126_v3 = vsub.f32 1.0, %v125_v58  ;;  %v443_v10 = vmul.f32 %v69_v59, %v350_v9  ;;  %vm149_vm6 = vcmp.eq.f32.partialorder %v148_v55, 8.507059e+37 }
  0x2b   :  { %v83_v0 = vadd.f32 %v232_v37, %v82_v56  ;;  %v112_v2 = vmul.f32 %v236_v45, %v111_v57  ;;  %v140_v7 = vmul.f32 %v240_v63, %v390_v36  ;;  %v242_v11 = vpop.eup %241  ;;  %vm145_vm2 = vweird.f32 %v240_v63 }
  0x2c   :  { %v98_v5 = vadd.f32 %v234_v41, %v97_v61  ;;  %v127_v14 = vmul.f32 %v238_v53, %v126_v3  ;;  %v155_v21 = vmul.f32 %v242_v11, %v398_v40  ;;  %243 = vrcp.f32 %v443_v10 }
  0x2d   :  { %v87_v12 = vsel %vm420_vm13, %v232_v37, %v83_v0  ;;  %v113_v13 = vadd.f32 %v236_v45, %v112_v2  ;;  %v141_v20 = vsub.f32 1.0, %v140_v7  ;;  %v60_v36 = vmul.f32 %v350_v9, %v45_v31 }
  0x2e   :  { %v92_v15 = vsel %vm383_vm3, %v91_v33, %v87_v12  ;;  %v102_v16 = vsel %vm428_vm0, %v234_v41, %v98_v5  ;;  %v128_v27 = vadd.f32 %v238_v53, %v127_v14  ;;  %v156_v32 = vsub.f32 1.0, %v155_v21  ;;  %vm473_vm3 = vmor %vm144_vm11, %vm145_vm2 }
  0x2f   :  { %v93_v23 = vmul.f32 %v92_v15, %v363_v19  ;;  %v107_v24 = vsel %vm392_vm5, %v106_v39, %v102_v16  ;;  %v117_v25 = vsel %vm436_vm1, %v236_v45, %v113_v13  ;;  %v142_v30 = vmul.f32 %v240_v63, %v141_v20 }
  0x30   :  { %v108_v28 = vmul.f32 %v107_v24, %v367_v22  ;;  %v122_v18 = vsel %vm400_vm7, %v121_v44, %v117_v25  ;;  %v132_v19 = vsel %vm454_vm4, %v238_v53, %v128_v27  ;;  %vm160_vm5 = vweird.f32 %v242_v11  ;;  %v70_v22 = vld [vmem:[#allocation5 + $0x38] sm:$0xff]  ;;  %v46_v53 = vld [vmem:[#allocation2 + $0x30] sm:$0xff] }
  0x31   :  { %199 = vst [vmem:[#allocation7] sm:$0xff] %v93_v23  ;;  %v123_v33 = vmul.f32 %v122_v18, %v373_v26  ;;  %v137_v35 = vsel %vm411_vm9, %v136_v47, %v132_v19  ;;  %v143_v37 = vadd.f32 %v240_v63, %v142_v30  ;;  %v157_v26 = vmul.f32 %v242_v11, %v156_v32  ;;  %vm161_vm7 = vmor %vm159_vm15, %vm160_vm5 }
  0x32   :  { %200 = vst [vmem:[#allocation7 + $0x8] sm:$0xff] %v108_v28  ;;  %v138_v38 = vmul.f32 %v137_v35, %v378_v29  ;;  %v166_v39 = vor.u32 1.1754944e-38, %v165_v8  ;;  %vm164_vm8 = vcmp.eq.f32.partialorder %v163_v4, 8.507059e+37  ;;  %v78_v43 = vmul.f32 %v70_v22, %v350_v9  ;;  %v244_v29 = vpop.eup %243 }
  0x33   :  { %201 = vst [vmem:[#allocation7 + $0x10] sm:$0xff] %v123_v33  ;;  %v147_v41 = vsel %vm473_vm3, %v240_v63, %v143_v37  ;;  %v158_v42 = vadd.f32 %v242_v11, %v157_v26  ;;  %v170_v40 = vmul.f32 %v244_v29, %v443_v10  ;;  %v180_v50 = vand.u32 2147483648, %v443_v10  ;;  %v47_v63 = vld [vmem:[#allocation2 + $0x38] sm:$0xff] }
  0x34   :  { %202 = vst [vmem:[#allocation7 + $0x18] sm:$0xff] %v138_v38  ;;  %v152_v44 = vsel %vm149_vm6, %v151_v62, %v147_v41  ;;  %245 = vrcp.f32 %v78_v43  ;;  %vm174_vm9 = vweird.f32 %v443_v10  ;;  %vm175_vm10 = vweird.f32 %v244_v29 }
  0x35   :  { %v153_v45 = vmul.f32 %v152_v44, %v407_v48  ;;  %v162_v46 = vsel %vm161_vm7, %v242_v11, %v158_v42  ;;  %v171_v51 = vsub.f32 1.0, %v170_v40  ;;  %v178_v52 = vand.u32 2147483647, %v443_v10  ;;  %vm176_vm11 = vmor %vm174_vm9, %vm175_vm10 }
  0x36   :  { %v167_v47 = vsel %vm164_vm8, %v166_v39, %v162_v46  ;;  %v181_v55 = vor.u32 1.1754944e-38, %v180_v50  ;;  %v61_v57 = vmul.f32 %v350_v9, %v46_v53  ;;  %v195_v59 = vand.u32 2147483648, %v78_v43 }
  0x37   :  { %203 = vst [vmem:[#allocation7 + $0x20] sm:$0xff] %v153_v45  ;;  %v168_v49 = vmul.f32 %v167_v47, %v60_v36  ;;  %v172_v48 = vmul.f32 %v244_v29, %v171_v51  ;;  %vm179_vm12 = vcmp.eq.f32.partialorder %v178_v52, 8.507059e+37  ;;  %vm189_vm13 = vweird.f32 %v78_v43 }
  0x38   :  { %v193_v61 = vand.u32 2147483647, %v78_v43  ;;  %v196_v3 = vor.u32 1.1754944e-38, %v195_v59  ;;  %v62_v4 = vmul.f32 %v350_v9, %v47_v63 }
  0x39   :  { %204 = vst [vmem:[#allocation7 + $0x28] sm:$0xff] %v168_v49  ;;  %v173_v58 = vadd.f32 %v244_v29, %v172_v48 }
  0x3a   :  { %v246_v54 = vpop.eup %245  ;;  %vm194_vm0 = vcmp.eq.f32.partialorder %v193_v61, 8.507059e+37 }
  0x3b   :  { %v185_v56 = vmul.f32 %v246_v54, %v78_v43  ;;  %vm190_vm14 = vweird.f32 %v246_v54  ;;  %v177_v62 = vsel %vm176_vm11, %v244_v29, %v173_v58 }
  0x3c   :  { %v182_v0 = vsel %vm179_vm12, %v181_v55, %v177_v62  ;;  %vm191_vm15 = vmor %vm189_vm13, %vm190_vm14 }
  0x3d   :  { %v186_v60 = vsub.f32 1.0, %v185_v56  ;;  %v183_v2 = vmul.f32 %v182_v0, %v61_v57 }
  0x3f   :  { %v187_v1 = vmul.f32 %v246_v54, %v186_v60  ;;  %205 = vst [vmem:[#allocation7 + $0x30] sm:$0xff] %v183_v2 }
  0x41   :  { %v188_v5 = vadd.f32 %v246_v54, %v187_v1 }
  0x43   :  { %v192_v6 = vsel %vm191_vm15, %v246_v54, %v188_v5 }
  0x44   :  { %v197_v7 = vsel %vm194_vm0, %v196_v3, %v192_v6 }
  0x45   :  { %v198_v8 = vmul.f32 %v197_v7, %v62_v4 }
  0x47   :  { %206 = vst [vmem:[#allocation7 + $0x38] sm:$0xff] %v198_v8 }
  0x48   :  { %217 = dma.vmem_to_hbm [thread:$0]  %s213_s1, 1024, %s215_s21, [#allocation4]  }
  0x49   :  { %323 = dma.done.wait [#allocation4], 1024  }
  0x4a   :  { %324 = vsyncadd [#allocation4], 4294966272 }
  0x4b   :  { %222 = vsyncpa [#allocation3], 1 }
  0x4c   :  { %223 = vsyncpa [#allocation6], 1 }
  0x4d   :  { %224 = vsyncpa [#allocation4], 1 }

</bundles_post_ra>
